<compile_context>
chip_gen: v5e
topology: v5e:2x2
jax: 0.10.0
libtpu: 0.0.40
codegen_flags: <defaults>
</compile_context>

<pallas_src>
import functools

import jax
import jax.numpy as jnp
from jax.experimental import pallas as pl
from jax.experimental.pallas import tpu as pltpu

LANE = 128    # TPU lane width
H1 = 128      # fc1 output width (already lane aligned)
H2P = 128     # fc2 output width padded from 64 (padding is exact: zero w/b, relu(0)=0)


def _round_up(n, m):
    return ((n + m - 1) // m) * m


def _choose_tb(batch, tb_max=512):
    """Batch tile: multiple of 8, <= tb_max, >=2 tiles for large batches (v7x)."""
    b8 = _round_up(batch, 8)
    if b8 <= 256:
        return b8                       # small batch: one tile, minimal padding
    tb = _round_up((b8 + 1) // 2, 8)    # aim for at least 2 tiles (megacore)
    return min(tb, tb_max)


def dqn_kernel(x_ref, w1_ref, w23_ref, b12_ref, b3_ref, o_ref):
    """One batch tile of the fused 3-layer MLP.

    x_ref:   (TB, state_dim)   f32   raw input tile (cast to bf16 here)
    w1_ref:  (state_dim, 128)  bf16  fc1 weight (in, out) layout
    w23_ref: (256, 128)        bf16  [w2_padded; w3_padded] stacked along rows
    b12_ref: (8, 128)          f32   rows 0,1 = b1, b2 (zero padded)
    b3_ref:  (1, action_dim)   f32   fc3 bias (true width)
    o_ref:   (TB, action_dim)  f32   narrow output tile
    """
    bf16 = jnp.bfloat16
    x = x_ref[...].astype(bf16)

    # fc1 + relu (bf16 operands, f32 accumulation)
    h1 = jnp.dot(x, w1_ref[...], preferred_element_type=jnp.float32)
    h1 = jnp.maximum(h1 + b12_ref[0:1, :], 0.0)

    # fc2 + relu
    h2 = jnp.dot(h1.astype(bf16), w23_ref[0:H1, :],
                 preferred_element_type=jnp.float32)
    h2 = jnp.maximum(h2 + b12_ref[1:2, :], 0.0)

    # fc3 (no activation); store only the real action lanes
    q = jnp.dot(h2.astype(bf16), w23_ref[H1:H1 + H2P, :],
                preferred_element_type=jnp.float32)
    a = o_ref.shape[1]
    o_ref[...] = (q[:, :a] + b3_ref[...]).astype(o_ref.dtype)


def prepare_params(params):
    """One-time packing: pad weights to 128 lanes, cast to bf16, stack w2/w3."""
    w1, b1 = params["w1"], params["b1"]   # (state_dim, 128), (1, 128)
    w2, b2 = params["w2"], params["b2"]   # (128, 64),        (1, 64)
    w3, b3 = params["w3"], params["b3"]   # (64, action_dim), (1, action_dim)
    action_dim = w3.shape[1]
    bf16 = jnp.bfloat16

    w1b = w1.astype(bf16)                                                # (state_dim, 128)
    w2p = jnp.zeros((H1, LANE), bf16).at[:, :w2.shape[1]].set(w2.astype(bf16))
    w3p = jnp.zeros((H2P, LANE), bf16).at[:w3.shape[0], :action_dim].set(w3.astype(bf16))
    w23 = jnp.concatenate([w2p, w3p], axis=0)                            # (256, 128)

    b12 = jnp.zeros((8, LANE), jnp.float32)
    b12 = b12.at[0, :b1.shape[-1]].set(b1.reshape(-1).astype(jnp.float32))
    b12 = b12.at[1, :b2.shape[-1]].set(b2.reshape(-1).astype(jnp.float32))
    b3r = b3.reshape(1, action_dim).astype(jnp.float32)

    return {"w1": w1b, "w23": w23, "b12": b12, "b3": b3r}


@functools.partial(jax.jit, static_argnames=("tb_max",))
def dqn_forward(x, packed, *, tb_max=512):
    """Fused DQN forward. x: (B, state_dim) f32. packed: prepare_params output."""
    w1, w23, b12, b3 = packed["w1"], packed["w23"], packed["b12"], packed["b3"]
    B, state_dim = x.shape
    action_dim = b3.shape[1]

    TB = _choose_tb(B, tb_max)
    bp = _round_up(B, TB)
    # Zero-pad the batch only when needed (padded rows produce garbage Q-values
    # that are sliced off; rows are independent so nothing else is affected).
    xp = x if bp == B else jnp.zeros((bp, state_dim), x.dtype).at[:B].set(x)

    grid = (bp // TB,)
    out = pl.pallas_call(
        dqn_kernel,
        out_shape=jax.ShapeDtypeStruct((bp, action_dim), jnp.float32),
        grid_spec=pltpu.PrefetchScalarGridSpec(
            num_scalar_prefetch=0,
            grid=grid,
            in_specs=[
                pl.BlockSpec((TB, state_dim), lambda i: (i, 0)),     # x: tiled over batch
                pl.BlockSpec((state_dim, H1), lambda i: (0, 0)),     # w1: VMEM-resident
                pl.BlockSpec((H1 + H2P, LANE), lambda i: (0, 0)),    # w2|w3: VMEM-resident
                pl.BlockSpec((8, LANE), lambda i: (0, 0)),           # b1,b2: VMEM-resident
                pl.BlockSpec((1, action_dim), lambda i: (0, 0)),     # b3: VMEM-resident
            ],
            out_specs=pl.BlockSpec((TB, action_dim), lambda i: (i, 0)),
        ),
        compiler_params=pltpu.CompilerParams(
            dimension_semantics=("parallel",),   # shard batch tiles across TCs (v7x)
        ),
    )(xp, w1, w23, b12, b3)

    return out if bp == B else out[:B]


def init_dqn_params(key, state_dim, action_dim):
    """Deterministic init (uniform like PyTorch's default Linear init)."""
    def linear(k, fan_in, fan_out):
        kw, kb = jax.random.split(k)
        bound = 1.0 / jnp.sqrt(fan_in)
        # Stored as (in_features, out_features) == W_pt.T
        w = jax.random.uniform(kw, (fan_in, fan_out), jnp.float32, -bound, bound)
        b = jax.random.uniform(kb, (1, fan_out), jnp.float32, -bound, bound)
        return w, b

    k1, k2, k3 = jax.random.split(key, 3)
    w1, b1 = linear(k1, state_dim, 128)
    w2, b2 = linear(k2, 128, 64)
    w3, b3 = linear(k3, 64, action_dim)
    return {"w1": w1, "b1": b1, "w2": w2, "b2": b2, "w3": w3, "b3": b3}


def dqn_reference(x, p):
    h1 = jnp.maximum(x @ p["w1"] + p["b1"], 0.0)
    h2 = jnp.maximum(h1 @ p["w2"] + p["b2"], 0.0)
    return h2 @ p["w3"] + p["b3"]


if __name__ == "__main__":
    key = jax.random.PRNGKey(0)
    kx, kp = jax.random.split(key)

    batch, state_dim, action_dim = 2, 16, 4
    x = jax.random.normal(kx, (batch, state_dim), jnp.float32)
    params = init_dqn_params(kp, state_dim, action_dim)
    packed = prepare_params(params)   # one-time weight packing (not per call)

    out = dqn_forward(x, packed)
    out = jax.block_until_ready(out)

    ref = dqn_reference(x, params)
    assert out.shape == (batch, action_dim)
    # bf16 matmul operands (f32 accumulation) -> relaxed tolerance vs f32 ref.
    assert jnp.allclose(out, ref, atol=5e-2, rtol=5e-2), (out, ref)

    print("KERNEL_OK")
</pallas_src>

<mosaic_0001>
module attributes {stable_mosaic.version = 11 : i64} {
  func.func @dqn_kernel(%arg0: i32, %arg1: memref<8x16xf32, #tpu.memory_space<vmem>>, %arg2: memref<16x128xbf16, #tpu.memory_space<vmem>>, %arg3: memref<256x128xbf16, #tpu.memory_space<vmem>>, %arg4: memref<8x128xf32, #tpu.memory_space<vmem>>, %arg5: memref<1x4xf32, #tpu.memory_space<vmem>>, %arg6: memref<8x4xf32, #tpu.memory_space<vmem>>) attributes {dimension_semantics = [#tpu.dimension_semantics<parallel>], iteration_bounds = array<i64: 1>, scalar_prefetch = 0 : i64, scratch_operands = 0 : i64, tpu.core_type = #tpu.core_type<tc>, window_params = [{transform_indices = @transform_0, window_bounds = array<i64: 8, 16>}, {pipeline_mode = #tpu.pipeline_mode<synchronous>, transform_indices = @transform_1, window_bounds = array<i64: 16, 128>}, {pipeline_mode = #tpu.pipeline_mode<synchronous>, transform_indices = @transform_2, window_bounds = array<i64: 256, 128>}, {pipeline_mode = #tpu.pipeline_mode<synchronous>, transform_indices = @transform_3, window_bounds = array<i64: 8, 128>}, {pipeline_mode = #tpu.pipeline_mode<synchronous>, transform_indices = @transform_4, window_bounds = array<i64: 1, 4>}, {transform_indices = @transform_5, window_bounds = array<i64: 8, 4>}]} {
    %c0 = arith.constant 0 : index
    %c0_0 = arith.constant 0 : index
    %0 = vector.load %arg1[%c0, %c0_0] : memref<8x16xf32, #tpu.memory_space<vmem>>, vector<8x16xf32>
    %1 = arith.truncf %0 : vector<8x16xf32> to vector<8x16xbf16>
    %c0_1 = arith.constant 0 : index
    %c0_2 = arith.constant 0 : index
    %2 = vector.load %arg2[%c0_1, %c0_2] : memref<16x128xbf16, #tpu.memory_space<vmem>>, vector<16x128xbf16>
    %cst = arith.constant dense<0.000000e+00> : vector<8x128xf32>
    %3 = tpu.matmul %1, %2, %cst {dimension_numbers = #tpu.dot_dimension_numbers<[1], [0], [0], [1], [0, 0, 1, 1], [], []>} : vector<8x16xbf16>, vector<16x128xbf16>, vector<8x128xf32> -> vector<8x128xf32>
    %c0_3 = arith.constant 0 : index
    %c0_4 = arith.constant 0 : index
    %4 = vector.load %arg4[%c0_3, %c0_4] : memref<8x128xf32, #tpu.memory_space<vmem>>, vector<1x128xf32>
    %5 = vector.broadcast %4 : vector<1x128xf32> to vector<8x128xf32>
    %6 = arith.addf %3, %5 : vector<8x128xf32>
    %cst_5 = arith.constant 0.000000e+00 : f32
    %7 = vector.broadcast %cst_5 : f32 to vector<8x128xf32>
    %8 = arith.maximumf %6, %7 : vector<8x128xf32>
    %9 = arith.truncf %8 : vector<8x128xf32> to vector<8x128xbf16>
    %c0_6 = arith.constant 0 : index
    %c0_7 = arith.constant 0 : index
    %10 = vector.load %arg3[%c0_6, %c0_7] : memref<256x128xbf16, #tpu.memory_space<vmem>>, vector<128x128xbf16>
    %cst_8 = arith.constant dense<0.000000e+00> : vector<8x128xf32>
    %11 = tpu.matmul %9, %10, %cst_8 {dimension_numbers = #tpu.dot_dimension_numbers<[1], [0], [0], [1], [0, 0, 1, 1], [], []>} : vector<8x128xbf16>, vector<128x128xbf16>, vector<8x128xf32> -> vector<8x128xf32>
    %c1 = arith.constant 1 : index
    %c0_9 = arith.constant 0 : index
    %12 = vector.load %arg4[%c1, %c0_9] : memref<8x128xf32, #tpu.memory_space<vmem>>, vector<1x128xf32>
    %13 = vector.broadcast %12 : vector<1x128xf32> to vector<8x128xf32>
    %14 = arith.addf %11, %13 : vector<8x128xf32>
    %cst_10 = arith.constant 0.000000e+00 : f32
    %15 = vector.broadcast %cst_10 : f32 to vector<8x128xf32>
    %16 = arith.maximumf %14, %15 : vector<8x128xf32>
    %17 = arith.truncf %16 : vector<8x128xf32> to vector<8x128xbf16>
    %c128 = arith.constant 128 : index
    %c0_11 = arith.constant 0 : index
    %18 = vector.load %arg3[%c128, %c0_11] : memref<256x128xbf16, #tpu.memory_space<vmem>>, vector<128x128xbf16>
    %cst_12 = arith.constant dense<0.000000e+00> : vector<8x128xf32>
    %19 = tpu.matmul %17, %18, %cst_12 {dimension_numbers = #tpu.dot_dimension_numbers<[1], [0], [0], [1], [0, 0, 1, 1], [], []>} : vector<8x128xbf16>, vector<128x128xbf16>, vector<8x128xf32> -> vector<8x128xf32>
    %20 = vector.extract_strided_slice %19 {offsets = [0, 0], sizes = [8, 4], strides = [1, 1]} : vector<8x128xf32> to vector<8x4xf32>
    %c0_13 = arith.constant 0 : index
    %c0_14 = arith.constant 0 : index
    %21 = vector.load %arg5[%c0_13, %c0_14] : memref<1x4xf32, #tpu.memory_space<vmem>>, vector<1x4xf32>
    %22 = vector.broadcast %21 : vector<1x4xf32> to vector<8x4xf32>
    %23 = arith.addf %20, %22 : vector<8x4xf32>
    %c0_15 = arith.constant 0 : index
    %c0_16 = arith.constant 0 : index
    %24 = vector.load %arg6[%c0_15, %c0_16] : memref<8x4xf32, #tpu.memory_space<vmem>>, vector<8x4xf32>
    tpu.vector_store %arg6[%c0_15, %c0_16], %23 {strides = array<i32>} : memref<8x4xf32, #tpu.memory_space<vmem>>, vector<8x4xf32>,
    return
  }
  func.func @transform_0(%arg0: i32) -> (i32, i32) {
    %c0_i32 = arith.constant 0 : i32
    %c0_i32_0 = arith.constant 0 : i32
    return %arg0, %c0_i32 : i32, i32
  }
  func.func @transform_1(%arg0: i32) -> (i32, i32) {
    %c0_i32 = arith.constant 0 : i32
    %c0_i32_0 = arith.constant 0 : i32
    %c0_i32_1 = arith.constant 0 : i32
    return %c0_i32, %c0_i32_0 : i32, i32
  }
  func.func @transform_2(%arg0: i32) -> (i32, i32) {
    %c0_i32 = arith.constant 0 : i32
    %c0_i32_0 = arith.constant 0 : i32
    %c0_i32_1 = arith.constant 0 : i32
    return %c0_i32, %c0_i32_0 : i32, i32
  }
  func.func @transform_3(%arg0: i32) -> (i32, i32) {
    %c0_i32 = arith.constant 0 : i32
    %c0_i32_0 = arith.constant 0 : i32
    %c0_i32_1 = arith.constant 0 : i32
    return %c0_i32, %c0_i32_0 : i32, i32
  }
  func.func @transform_4(%arg0: i32) -> (i32, i32) {
    %c0_i32 = arith.constant 0 : i32
    %c0_i32_0 = arith.constant 0 : i32
    %c0_i32_1 = arith.constant 0 : i32
    return %c0_i32, %c0_i32_0 : i32, i32
  }
  func.func @transform_5(%arg0: i32) -> (i32, i32) {
    %c0_i32 = arith.constant 0 : i32
    %c0_i32_0 = arith.constant 0 : i32
    return %arg0, %c0_i32 : i32, i32
  }
}

</mosaic_0001>

<bundles_post_ra>
// kernel: dqn_forward.1
= control target key start
LH: loop header
LB: loop body
LE: loop exit
PB: predicated region body
PF: predicated region fallthrough
CT: control target
= control target key end

     0   :  { %10 = vsyncpa [#allocation3], 0  ;;  %s450_s0 = inlined_call_operand.vmem [shape: f32[8,16], index: 0, kind: input, shape index: {}]   ;;  %s451_s1 = inlined_call_operand.vmem [shape: bf16[16,128], index: 1, kind: input, shape index: {}]   ;;  %s452_s2 = inlined_call_operand.hbm [shape: bf16[256,128], index: 2, kind: input, shape index: {}]   ;;  %s453_s3 = inlined_call_operand.hbm [shape: f32[8,128], index: 3, kind: input, shape index: {}]   ;;  %s454_s4 = inlined_call_operand.vmem [shape: f32[1,4], index: 4, kind: input, shape index: {}]   ;;  %s455_s5 = inlined_call_operand.vmem [shape: f32[8,4], index: 5, kind: output, shape index: {}]  }
   0x1   :  { %s20_s20 = sshll.u32 %s452_s2, 4  ;;  %s21_s20 = int_to_ptr.hbm [resolvable:$true] %s20_s20 }
   0x2   :  { %11 = vsyncpa [#allocation5], 0  ;;  %s398_s21 = smov [#allocation2]   ;;  %s34_s25 = sshll.u32 %s453_s3, 4  ;;  %s35_s25 = int_to_ptr.hbm [resolvable:$true] %s34_s25 }
   0x3   :  { %s22_s22 = sshll.u32 %s398_s21, 4  ;;  %s399_s26 = smov 64   ;;  %s23_s22 = int_to_ptr.vmem [resolvable:$true] %s22_s22 }
   0x4   :  { %s400_s27 = smov 4   ;;  %s401_s28 = smov [#allocation4]  }
   0x5   :  { %28 = dma.hbm_to_vmem [thread:$0]  %s21_s20, 2048, %s23_s22, [#allocation3], %s399_s26, %s399_s26, %s400_s27  }
   0x6   :  { %s36_s29 = sshll.u32 %s401_s28, 4  ;;  %s37_s29 = int_to_ptr.vmem [resolvable:$true] %s36_s29 }
   0x7   :  { %39 = dma.hbm_to_vmem [thread:$0]  %s35_s25, 128, %s37_s29, [#allocation5]  }
   0x8   :  { %394 = dma.done.wait [#allocation3], 2048  }
   0x9   :  { %395 = vsyncadd [#allocation3], 4294965248 }
   0xa   :  { %396 = dma.done.wait [#allocation5], 128  }
   0xb   :  { %397 = vsyncadd [#allocation5], 4294967168  ;;  %v322_v0 = vld [vmem:[%s451_s1] sm:$0xff]  ;;  %v330_v2 = vld [vmem:[#allocation2 + $0x38] sm:$0xff]  ;;  %vm63_vm0 = vcmask 130048   ;;  %vm245_vm1 = vcmask 31744  }
   0xc   :  { %v51_v1 = vld [vmem:[%s450_s0] sm:$0xff]  ;;  %74 = vmatpush.bf16.msra.mxu0 %v322_v0  ;;  %148 = vmatpush.bf16.msra.mxu1 %v330_v2  ;;  %v329_v4 = vld [vmem:[#allocation2 + $0x30] sm:$0xff]  ;;  %v328_v5 = vld [vmem:[#allocation2 + $0x28] sm:$0xff] }
   0xd   :  { %v52_v3 = vpack.c.bf16 %v51_v1, %v51_v1  ;;  %v327_v6 = vld [vmem:[#allocation2 + $0x20] sm:$0xff]  ;;  %v326_v7 = vld [vmem:[#allocation2 + $0x18] sm:$0xff]  ;;  %v325_v8 = vld [vmem:[#allocation2 + $0x10] sm:$0xff] }
   0xe   :  { %v324_v9 = vld [vmem:[#allocation2 + $0x8] sm:$0xff]  ;;  %v323_v10 = vld [vmem:[#allocation2] sm:$0xff]  ;;  %v338_v11 = vld [vmem:[#allocation2 + $0x78] sm:$0xff] }
   0xf   :  { %257 = vmatmul.msk.bf16.vlgmr.msra.gmra.mxu0 %vm63_vm0, %v52_v3  ;;  %227 = vmatpush.bf16.msra.mxu2 %v338_v11  ;;  %v337_v12 = vld [vmem:[#allocation2 + $0x70] sm:$0xff]  ;;  %v336_v13 = vld [vmem:[#allocation2 + $0x68] sm:$0xff]  ;;  %v335_v14 = vld [vmem:[#allocation2 + $0x60] sm:$0xff] }
  0x10   :  { %149 = vmatpush.bf16.msra.mxu1 %v329_v4  ;;  %v334_v15 = vld [vmem:[#allocation2 + $0x58] sm:$0xff]  ;;  %v333_v16 = vld [vmem:[#allocation2 + $0x50] sm:$0xff]  ;;  %v343_v17 = vld [vmem:[#allocation4] ss:$0 sm:$0xff] }
  0x11   :  { %v332_v23 = vld [vmem:[#allocation2 + $0x48] sm:$0xff]  ;;  %v331_v24 = vld [vmem:[#allocation2 + $0x40] sm:$0xff] }
  0x12   :  { %v344_v25 = vld [vmem:[#allocation4 + $0x1] ss:$0 sm:$0xff]  ;;  %v345_v31 = vld [vmem:[%s454_s4] ss:$0 sm:$0xff] }
  0x13   :  { %228 = vmatpush.bf16.msra.mxu2 %v337_v12 }
  0x14   :  { %150 = vmatpush.bf16.msra.mxu1 %v328_v5 }
  0x17   :  { %229 = vmatpush.bf16.msra.mxu2 %v336_v13 }
  0x18   :  { %151 = vmatpush.bf16.msra.mxu1 %v327_v6 }
  0x1b   :  { %230 = vmatpush.bf16.msra.mxu2 %v335_v14 }
  0x1c   :  { %152 = vmatpush.bf16.msra.mxu1 %v326_v7 }
  0x1f   :  { %231 = vmatpush.bf16.msra.mxu2 %v334_v15 }
  0x20   :  { %153 = vmatpush.bf16.msra.mxu1 %v325_v8 }
  0x23   :  { %232 = vmatpush.bf16.msra.mxu2 %v333_v16 }
  0x24   :  { %154 = vmatpush.bf16.msra.mxu1 %v324_v9 }
  0x27   :  { %233 = vmatpush.bf16.msra.mxu2 %v332_v23 }
  0x28   :  { %155 = vmatpush.bf16.msra.mxu1 %v323_v10 }
  0x2b   :  { %234 = vmatpush.bf16.msra.mxu2 %v331_v24 }
  0x8c   :  { %v76_v18 = vpop.f32.mrf.mxu0 }
  0x8d   :  { %v77_v19 = vadd.f32 %v343_v17, %v76_v18 }
  0x8f   :  { %v80_v20 = vmax.f32 %v77_v19, 0.0 }
  0x91   :  { %v81_v21 = vpack.c.bf16 %v80_v20, %v80_v20 }
  0x93   :  { %156 = vmatmul.bf16.vlgmr.msra.gmra.mxu1 %v81_v21 }
  0x94   :  { %v78_v22 = vpop.f32.mrf.mxu0 }
 0x110   :  { %v157_v26 = vpop.f32.mrf.mxu1 }
 0x111   :  { %v158_v27 = vadd.f32 %v344_v25, %v157_v26 }
 0x113   :  { %v161_v28 = vmax.f32 %v158_v27, 0.0 }
 0x115   :  { %v162_v29 = vpack.c.bf16 %v161_v28, %v161_v28 }
 0x117   :  { %235 = vmatmul.bf16.vlgmr.msra.gmra.mxu2 %v162_v29 }
 0x118   :  { %v159_v30 = vpop.f32.mrf.mxu1 }
 0x19a   :  { %v236_v32 = vpop.f32.mrf.mxu2 }
 0x19b   :  { %v244_v33 = vadd.f32 %v345_v31, %v236_v32 }
 0x19d   :  { %246 = vst.msk [vmem:[%s455_s5] sm:$0xff] %vm245_vm1, %v244_v33 }
 0x1a2   :  { %v238_v34 = vpop.f32.mrf.mxu2 }
 0x1a3   :  { %251 = vsyncpa [#allocation3], 1 }
 0x1a4   :  { %252 = vsyncpa [#allocation5], 1 }

</bundles_post_ra>
